<compile_context>
chip_gen: v5e
topology: v5e:2x2
jax: 0.10.0
libtpu: 0.0.40
codegen_flags: <defaults>
</compile_context>

<pallas_src>
import functools

import jax
import jax.numpy as jnp
from jax import lax
from jax.experimental import pallas as pl
from jax.experimental.pallas import tpu as pltpu


def _cdiv(a, b):
    return (a + b - 1) // b


def _round_up(x, m):
    return ((x + m - 1) // m) * m


def _vmem_capacity_bytes():
    """Per-core VMEM capacity; conservative 64 MiB (v7x) fallback.

    The byte-targeted tile below only uses this as a guardrail for very large
    batch sizes, so a conservative fallback no longer shrinks the tile in the
    common case (unlike the previous revision, where it halved tk on v6e)."""
    try:
        info = pltpu.get_tpu_info()
        cap = getattr(info, "vmem_capacity_bytes", None)
        if cap:
            return int(cap)
    except Exception:
        pass
    return 64 * 1024 * 1024


def _gram_kernel(fs_ref, ft_ref, out_ref, *, ds, dt, tk, nbs, nbt, nbh,
                 total_blocks):
    """Accumulate partial Grams of f_s / f_t into out_ref[0, 0] / out_ref[0, 1].

    Grid: (nsplit, nbh).  Axis 0 ("parallel") selects which half of the
    reduction range this program owns (v7x: one half per TensorCore); axis 1
    ("arbitrary") walks that half.  Global reduction-block index kk = c*nbh+k.
    """
    c = pl.program_id(0)
    k = pl.program_id(1)
    kk = c * nbh + k

    @pl.when(k == 0)
    def _init():
        out_ref[...] = jnp.zeros_like(out_ref)

    def _accumulate(x_ref, slot, d, nb):
        rem = d % tk

        def do_block(masked):
            def body():
                x = x_ref[...]
                if masked:
                    # Edge block only: out-of-range columns of the VMEM buffer
                    # hold unspecified data; select (not multiply) them away.
                    col = lax.broadcasted_iota(jnp.int32, x.shape, 1)
                    x = jnp.where(col < rem, x, jnp.zeros_like(x))
                # NT contraction straight on the MXU (no explicit .T relayout);
                # bf16/f16 inputs consumed natively with f32 accumulation.
                gram = lax.dot_general(
                    x, x,
                    dimension_numbers=(((1,), (1,)), ((), ())),
                    preferred_element_type=jnp.float32)
                out_ref[0, slot] = out_ref[0, slot] + gram
            return body

        if rem == 0:
            if total_blocks > nb:
                # Grid can overrun this (smaller) input: skip past-the-end steps.
                pl.when(kk < nb)(do_block(masked=False))
            else:
                do_block(masked=False)()
        else:
            if nb > 1:
                pl.when(kk < nb - 1)(do_block(masked=False))   # steady state
            pl.when(kk == nb - 1)(do_block(masked=True))        # edge block only

    _accumulate(fs_ref, 0, ds, nbs)
    _accumulate(ft_ref, 1, dt, nbt)


def _pick_tile(bsz, max_d, itemsize, cap):
    """Byte-targeted reduction tile: ~2 MiB per input buffer per stage."""
    target_bytes = 2 * 1024 * 1024
    tk = max(128, target_bytes // max(1, bsz * itemsize))
    tk = min(tk, _round_up(max_d, 128))
    tk = max(128, (tk // 128) * 128)
    # Guardrail: double-buffered input tiles + resident (1,2,B,B) f32 output
    # accumulator must fit the VMEM budget; shrink (floored at 128) otherwise.
    budget = int(cap * 0.6)
    acc_bytes = 2 * (2 * bsz * bsz * 4)
    while tk > 128 and 4 * bsz * tk * itemsize + acc_bytes > budget:
        tk = max(128, ((tk // 2) // 128) * 128)
    return tk


def similarity_loss(g_s, g_t, *, tk=None):
    """Pallas implementation of Similarity().forward(g_s, g_t)."""
    bsz = g_s.shape[0]
    assert g_t.shape[0] == bsz

    # Flatten exactly like torch .view(bsz, -1) (row-major).  Keep the native
    # dtype: bf16 inputs stream at half the HBM bytes; MXU accumulates in f32.
    # (Note: native-bf16 streaming drifts slightly vs. an f32 PyTorch reference
    #  for very large D — widen tolerances accordingly when comparing.)
    f_s = jnp.reshape(g_s, (bsz, -1))
    f_t = jnp.reshape(g_t, (bsz, -1))
    ds, dt = f_s.shape[1], f_t.shape[1]
    max_d = max(ds, dt)

    itemsize = max(f_s.dtype.itemsize, f_t.dtype.itemsize)
    cap = _vmem_capacity_bytes()
    if tk is None:
        tk = _pick_tile(bsz, max_d, itemsize, cap)
    tk = max(128, (int(tk) // 128) * 128)
    tk = min(tk, _round_up(max_d, 128))

    nbs, nbt = _cdiv(ds, tk), _cdiv(dt, tk)
    nb_grid = max(nbs, nbt)
    # Split the reduction range in half across the leading "parallel" axis so
    # v7x's two TensorCores each stream half of both inputs; single-TC chips
    # just run it as a serial loop with the same total step count.
    nsplit = 2 if nb_grid >= 2 else 1
    nbh = _cdiv(nb_grid, nsplit)
    total_blocks = nsplit * nbh

    def in_index_map(nb):
        last = nb - 1

        def imap(c, k):
            # Clamp to this input's own last block; identical consecutive block
            # indices are de-duplicated (no re-DMA), and the kernel gates the
            # matmul with pl.when, so overrun steps cost essentially nothing.
            return (0, jnp.minimum(c * nbh + k, last))

        return imap

    needed_vmem = 4 * bsz * tk * itemsize + 2 * (2 * bsz * bsz * 4)
    vmem_limit = int(min(cap, max(32 * 1024 * 1024,
                                  needed_vmem + 8 * 1024 * 1024)))

    grams = pl.pallas_call(
        functools.partial(_gram_kernel, ds=ds, dt=dt, tk=tk, nbs=nbs, nbt=nbt,
                          nbh=nbh, total_blocks=total_blocks),
        out_shape=jax.ShapeDtypeStruct((nsplit, 2, bsz, bsz), jnp.float32),
        grid_spec=pltpu.PrefetchScalarGridSpec(
            num_scalar_prefetch=0,
            grid=(nsplit, nbh),
            in_specs=[
                pl.BlockSpec((bsz, tk), in_index_map(nbs)),
                pl.BlockSpec((bsz, tk), in_index_map(nbt)),
            ],
            out_specs=pl.BlockSpec((1, 2, bsz, bsz), lambda c, k: (c, 0, 0, 0)),
        ),
        compiler_params=pltpu.CompilerParams(
            dimension_semantics=("parallel", "arbitrary"),
            vmem_limit_bytes=vmem_limit,
        ),
    )(f_s, f_t)

    # Tiny epilogue on (B, B) matrices in plain JAX (fused by XLA); keeps the
    # kernel's VMEM footprint to input tiles + the Gram accumulators only.
    g_sum_s = jnp.sum(grams[:, 0], axis=0)
    g_sum_t = jnp.sum(grams[:, 1], axis=0)
    eps = jnp.float32(1e-12)  # F.normalize default eps
    # x * rsqrt(max(sum(x^2), eps^2)) == x / max(||x||_2, eps)
    inv_s = lax.rsqrt(jnp.maximum(
        jnp.sum(g_sum_s * g_sum_s, axis=1, keepdims=True), eps * eps))
    inv_t = lax.rsqrt(jnp.maximum(
        jnp.sum(g_sum_t * g_sum_t, axis=1, keepdims=True), eps * eps))
    g_diff = g_sum_t * inv_t - g_sum_s * inv_s
    loss = jnp.sum(g_diff * g_diff) / jnp.float32(bsz * bsz)
    # Match PyTorch return shape: .view(-1, 1).sum(0) -> shape (1,)
    return loss.reshape((1,))


def similarity_loss_ref(g_s, g_t):
    """Pure-JAX reference for validation."""
    bsz = g_s.shape[0]
    f_s = jnp.reshape(g_s, (bsz, -1)).astype(jnp.float32)
    f_t = jnp.reshape(g_t, (bsz, -1)).astype(jnp.float32)
    G_s = f_s @ f_s.T
    G_t = f_t @ f_t.T
    eps = 1e-12
    G_s = G_s / jnp.maximum(jnp.linalg.norm(G_s, axis=1, keepdims=True), eps)
    G_t = G_t / jnp.maximum(jnp.linalg.norm(G_t, axis=1, keepdims=True), eps)
    G_diff = G_t - G_s
    return jnp.sum(G_diff * G_diff).reshape((1,)) / (bsz * bsz)


if __name__ == "__main__":
    key = jax.random.PRNGKey(0)
    ks, kt, ks2, kt2 = jax.random.split(key, 4)

    # Primary check: matching NCHW student/teacher features, D = 4*16*16 = 1024.
    g_s = jax.random.normal(ks, (2, 4, 16, 16), dtype=jnp.float32)
    g_t = jax.random.normal(kt, (2, 4, 16, 16), dtype=jnp.float32)
    loss = jax.block_until_ready(similarity_loss(g_s, g_t))
    ref = jax.block_until_ready(similarity_loss_ref(g_s, g_t))
    assert loss.shape == (1,)
    assert jnp.allclose(loss, ref, rtol=1e-4, atol=1e-6), (loss, ref)

    # K-split path (nsplit=2) with full-width blocks: force a small tile so
    # nb_grid=8 and each "core" half accumulates 4 blocks of both inputs.
    loss1b = jax.block_until_ready(similarity_loss(g_s, g_t, tk=128))
    assert jnp.allclose(loss1b, ref, rtol=1e-4, atol=1e-6), (loss1b, ref)

    # Mismatched widths (ds=350 != dt=1024) with a forced small tile: exercises
    # the clamped index_map, pl.when overrun gating and edge-block-only masking.
    g_s2 = jax.random.normal(ks2, (2, 5, 10, 7), dtype=jnp.float32)   # D = 350
    g_t2 = jax.random.normal(kt2, (2, 4, 16, 16), dtype=jnp.float32)  # D = 1024
    loss2 = jax.block_until_ready(similarity_loss(g_s2, g_t2, tk=256))
    ref2 = jax.block_until_ready(similarity_loss_ref(g_s2, g_t2))
    assert jnp.allclose(loss2, ref2, rtol=1e-4, atol=1e-6), (loss2, ref2)

    print("KERNEL_OK")
</pallas_src>

<mosaic_0001>
module attributes {stable_mosaic.version = 11 : i64} {
  func.func @_gram_kernel(%arg0: i32, %arg1: i32, %arg2: memref<2x1024xf32, #tpu.memory_space<vmem>>, %arg3: memref<2x1024xf32, #tpu.memory_space<vmem>>, %arg4: memref<1x2x2x2xf32, #tpu.memory_space<vmem>>) attributes {dimension_semantics = [#tpu.dimension_semantics<parallel>, #tpu.dimension_semantics<arbitrary>], iteration_bounds = array<i64: 1, 1>, scalar_prefetch = 0 : i64, scratch_operands = 0 : i64, tpu.core_type = #tpu.core_type<tc>, window_params = [{transform_indices = @transform_0, window_bounds = array<i64: 2, 1024>}, {transform_indices = @transform_1, window_bounds = array<i64: 2, 1024>}, {transform_indices = @transform_2, window_bounds = array<i64: 1, 2, 2, 2>}]} {
    %c0_i32 = arith.constant 0 : i32
    %0 = arith.cmpi eq, %arg1, %c0_i32 : i32
    %1 = arith.extui %0 : i1 to i32
    %c0_i32_0 = arith.constant 0 : i32
    %2 = arith.cmpi ne, %1, %c0_i32_0 : i32
    scf.if %2 {
      %cst_20 = arith.constant 0.000000e+00 : f32
      %19 = vector.broadcast %cst_20 : f32 to vector<1x2x2x2xf32>
      %c0_21 = arith.constant 0 : index
      %c0_22 = arith.constant 0 : index
      %c0_23 = arith.constant 0 : index
      %c0_24 = arith.constant 0 : index
      %20 = vector.load %arg4[%c0_21, %c0_22, %c0_23, %c0_24] : memref<1x2x2x2xf32, #tpu.memory_space<vmem>>, vector<1x2x2x2xf32>
      tpu.vector_store %arg4[%c0_21, %c0_22, %c0_23, %c0_24], %19 {strides = array<i32>} : memref<1x2x2x2xf32, #tpu.memory_space<vmem>>, vector<1x2x2x2xf32>,
    } else {
    }
    %c0 = arith.constant 0 : index
    %c0_1 = arith.constant 0 : index
    %3 = vector.load %arg2[%c0, %c0_1] : memref<2x1024xf32, #tpu.memory_space<vmem>>, vector<2x1024xf32>
    %cst = arith.constant dense<0.000000e+00> : vector<2x2xf32>
    %4 = tpu.matmul %3, %3, %cst {dimension_numbers = #tpu.dot_dimension_numbers<[1], [1], [0], [0], [0, 0, 1, 0], [], []>} : vector<2x1024xf32>, vector<2x1024xf32>, vector<2x2xf32> -> vector<2x2xf32>
    %c0_2 = arith.constant 0 : index
    %c0_3 = arith.constant 0 : index
    %c0_4 = arith.constant 0 : index
    %c0_5 = arith.constant 0 : index
    %5 = vector.load %arg4[%c0_2, %c0_3, %c0_4, %c0_5] : memref<1x2x2x2xf32, #tpu.memory_space<vmem>>, vector<1x1x2x2xf32>
    %6 = vector.shape_cast %5 : vector<1x1x2x2xf32> to vector<2x2xf32>
    %7 = arith.addf %6, %4 : vector<2x2xf32>
    %c0_6 = arith.constant 0 : index
    %c0_7 = arith.constant 0 : index
    %c0_8 = arith.constant 0 : index
    %c0_9 = arith.constant 0 : index
    %8 = vector.load %arg4[%c0_6, %c0_7, %c0_8, %c0_9] : memref<1x2x2x2xf32, #tpu.memory_space<vmem>>, vector<1x1x2x2xf32>
    %9 = vector.shape_cast %8 : vector<1x1x2x2xf32> to vector<2x2xf32>
    %10 = vector.shape_cast %7 : vector<2x2xf32> to vector<1x1x2x2xf32>
    tpu.vector_store %arg4[%c0_6, %c0_7, %c0_8, %c0_9], %10 {strides = array<i32>} : memref<1x2x2x2xf32, #tpu.memory_space<vmem>>, vector<1x1x2x2xf32>,
    %c0_10 = arith.constant 0 : index
    %c0_11 = arith.constant 0 : index
    %11 = vector.load %arg3[%c0_10, %c0_11] : memref<2x1024xf32, #tpu.memory_space<vmem>>, vector<2x1024xf32>
    %cst_12 = arith.constant dense<0.000000e+00> : vector<2x2xf32>
    %12 = tpu.matmul %11, %11, %cst_12 {dimension_numbers = #tpu.dot_dimension_numbers<[1], [1], [0], [0], [0, 0, 1, 0], [], []>} : vector<2x1024xf32>, vector<2x1024xf32>, vector<2x2xf32> -> vector<2x2xf32>
    %c0_13 = arith.constant 0 : index
    %c1 = arith.constant 1 : index
    %c0_14 = arith.constant 0 : index
    %c0_15 = arith.constant 0 : index
    %13 = vector.load %arg4[%c0_13, %c1, %c0_14, %c0_15] : memref<1x2x2x2xf32, #tpu.memory_space<vmem>>, vector<1x1x2x2xf32>
    %14 = vector.shape_cast %13 : vector<1x1x2x2xf32> to vector<2x2xf32>
    %15 = arith.addf %14, %12 : vector<2x2xf32>
    %c0_16 = arith.constant 0 : index
    %c1_17 = arith.constant 1 : index
    %c0_18 = arith.constant 0 : index
    %c0_19 = arith.constant 0 : index
    %16 = vector.load %arg4[%c0_16, %c1_17, %c0_18, %c0_19] : memref<1x2x2x2xf32, #tpu.memory_space<vmem>>, vector<1x1x2x2xf32>
    %17 = vector.shape_cast %16 : vector<1x1x2x2xf32> to vector<2x2xf32>
    %18 = vector.shape_cast %15 : vector<2x2xf32> to vector<1x1x2x2xf32>
    tpu.vector_store %arg4[%c0_16, %c1_17, %c0_18, %c0_19], %18 {strides = array<i32>} : memref<1x2x2x2xf32, #tpu.memory_space<vmem>>, vector<1x1x2x2xf32>,
    return
  }
  func.func @transform_0(%arg0: i32, %arg1: i32) -> (i32, i32) {
    %c1_i32 = arith.constant 1 : i32
    %0 = arith.muli %arg0, %c1_i32 : i32
    %1 = arith.addi %0, %arg1 : i32
    %c0_i32 = arith.constant 0 : i32
    %2 = arith.minsi %1, %c0_i32 : i32
    %c0_i32_0 = arith.constant 0 : i32
    %c0_i32_1 = arith.constant 0 : i32
    return %c0_i32_0, %2 : i32, i32
  }
  func.func @transform_1(%arg0: i32, %arg1: i32) -> (i32, i32) {
    %c1_i32 = arith.constant 1 : i32
    %0 = arith.muli %arg0, %c1_i32 : i32
    %1 = arith.addi %0, %arg1 : i32
    %c0_i32 = arith.constant 0 : i32
    %2 = arith.minsi %1, %c0_i32 : i32
    %c0_i32_0 = arith.constant 0 : i32
    %c0_i32_1 = arith.constant 0 : i32
    return %c0_i32_0, %2 : i32, i32
  }
  func.func @transform_2(%arg0: i32, %arg1: i32) -> (i32, i32, i32, i32) {
    %c0_i32 = arith.constant 0 : i32
    %c0_i32_0 = arith.constant 0 : i32
    %c0_i32_1 = arith.constant 0 : i32
    %c0_i32_2 = arith.constant 0 : i32
    return %arg0, %c0_i32, %c0_i32_0, %c0_i32_1 : i32, i32, i32, i32
  }
}

</mosaic_0001>

<bundles_post_ra>
// kernel: tpu_custom_call.1
= control target key start
LH: loop header
LB: loop body
LE: loop exit
PB: predicated region body
PF: predicated region fallthrough
CT: control target
= control target key end

     0   :  { %7 = vsyncpa [#allocation3], 0  ;;  %s621_s0 = inlined_call_operand.hbm [shape: f32[2,1024], index: 0, kind: input, shape index: {}]   ;;  %s622_s1 = inlined_call_operand.hbm [shape: f32[2,1024], index: 1, kind: input, shape index: {}]   ;;  %s623_s2 = inlined_call_operand.hbm [shape: f32[1,2,2,2], index: 2, kind: output, shape index: {}]  }
   0x1   :  { %8 = vsyncpa [#allocation6], 0 }
   0x2   :  { %9 = vsyncpa [#allocation4], 0  ;;  %s21_s11 = sshll.u32 %s621_s0, 4  ;;  %s587_s12 = smov [#allocation2]   ;;  %s22_s11 = int_to_ptr.hbm [resolvable:$true] %s21_s11 }
   0x3   :  { %s23_s13 = sshll.u32 %s587_s12, 4  ;;  %s38_s16 = sshll.u32 %s622_s1, 4  ;;  %s24_s13 = int_to_ptr.vmem [resolvable:$true] %s23_s13  ;;  %s39_s16 = int_to_ptr.hbm [resolvable:$true] %s38_s16 }
   0x4   :  { %26 = dma.hbm_to_vmem [thread:$0]  %s22_s11, 256, %s24_s13, [#allocation3]  }
   0x5   :  { %s588_s17 = smov [#allocation5]  }
   0x6   :  { %s40_s18 = sshll.u32 %s588_s17, 4  ;;  %s41_s18 = int_to_ptr.vmem [resolvable:$true] %s40_s18 }
   0x7   :  { %43 = dma.hbm_to_vmem [thread:$0]  %s39_s16, 256, %s41_s18, [#allocation6]  }
   0x8   :  { %581 = dma.done.wait [#allocation3], 256  }
   0x9   :  { %582 = vsyncadd [#allocation3], 4294967040 }
   0xa   :  { %583 = dma.done.wait [#allocation6], 256  }
   0xb   :  { %584 = vsyncadd [#allocation6], 4294967040  ;;  %v67_v0 = vld [vmem:[#allocation2] sm:$0xff]  ;;  %v68_v1 = vld [vmem:[#allocation2 + $0x8] sm:$0xff]  ;;  %vm64_vm0 = vcmask 9216   ;;  %v589_v36 = vmov 0.0  }
   0xc   :  { %71 = vst [vmem:[#allocation1] ss:$4 sm:$0xff] %v67_v0  ;;  %v273_v10 = vld [vmem:[#allocation5] sm:$0xff]  ;;  %v274_v15 = vld [vmem:[#allocation5 + $0x8] sm:$0xff]  ;;  %s590_s0 = smov [#allocation7]   ;;  %s485_s21 = sshll.u32 %s623_s2, 4  ;;  %s486_s21 = int_to_ptr.hbm [resolvable:$true] %s485_s21 }
   0xd   :  { %73 = vst [vmem:[#allocation1 + $0x20] ss:$4 sm:$0xff] %v68_v1  ;;  %s483_s1 = sshll.u32 %s590_s0, 4  ;;  %s591_s22 = smov 32   ;;  %s484_s1 = int_to_ptr.vmem [resolvable:$true] %s483_s1 }
   0xe   :  { %65 = vst.msk [vmem:[#allocation7] sm:$0x3] %vm64_vm0, %v589_v36  ;;  %s592_s23 = smov 2  }
   0xf   :  { %66 = vst.msk [vmem:[#allocation7 + $0x2] sm:$0x3] %vm64_vm0, %v589_v36 }
  0x13   :  { %v74_v2 = vld.sshfl [vmem:[#allocation1] sm:$0xff pattern:$0x73625140]  ;;  %v75_v3 = vld.sshfl [vmem:[#allocation1 + $0x8] sm:$0xff pattern:$0x73625140] }
  0x14   :  { %v76_v4 = vld.sshfl [vmem:[#allocation1 + $0x10] sm:$0xff pattern:$0x73625140]  ;;  %v77_v5 = vld.sshfl [vmem:[#allocation1 + $0x18] sm:$0xff pattern:$0x73625140] }
  0x15   :  { %90 = vst [vmem:[#allocation1] ss:$4 sm:$0xff] %v67_v0  ;;  %v78_v6 = vld.sshfl [vmem:[#allocation1 + $0x20] sm:$0xff pattern:$0x73625140] }
  0x16   :  { %v79_v7 = vld.sshfl [vmem:[#allocation1 + $0x28] sm:$0xff pattern:$0x73625140]  ;;  %v80_v8 = vld.sshfl [vmem:[#allocation1 + $0x30] sm:$0xff pattern:$0x73625140] }
  0x17   :  { %v81_v9 = vld.sshfl [vmem:[#allocation1 + $0x38] sm:$0xff pattern:$0x73625140]  ;;  %v269_v51 = vld [vmem:[#allocation7] sm:$0x3] }
  0x18   :  { %92 = vst [vmem:[#allocation1 + $0x20] ss:$4 sm:$0xff] %v68_v1 }
  0x1c   :  { %v95_v11 = vld.sshfl [vmem:[#allocation1 + $0x10] sm:$0xff pattern:$0x73625140]  ;;  %v93_v12 = vld.sshfl [vmem:[#allocation1] sm:$0xff pattern:$0x73625140] }
  0x1d   :  { %164 = vmatpush.xpose.msra.mxu2 %v95_v11  ;;  %124 = vmatpush.xpose.msra.mxu0 %v93_v12  ;;  %v96_v13 = vld.sshfl [vmem:[#allocation1 + $0x18] sm:$0xff pattern:$0x73625140]  ;;  %v94_v14 = vld.sshfl [vmem:[#allocation1 + $0x8] sm:$0xff pattern:$0x73625140] }
  0x1e   :  { %184 = vmatpush.xpose.msra.mxu3 %v96_v13  ;;  %144 = vmatpush.xpose.msra.mxu1 %v94_v14  ;;  %277 = vst [vmem:[#allocation1] ss:$4 sm:$0xff] %v273_v10 }
  0x1f   :  { %v99_v16 = vld.sshfl [vmem:[#allocation1 + $0x30] sm:$0xff pattern:$0x73625140]  ;;  %v97_v17 = vld.sshfl [vmem:[#allocation1 + $0x20] sm:$0xff pattern:$0x73625140] }
  0x20   :  { %165 = vmatmul.f32.vlgmr.msra.gmra.mxu2 %v76_v4  ;;  %125 = vmatmul.f32.vlgmr.msra.gmra.mxu0 %v74_v2  ;;  %v100_v18 = vld.sshfl [vmem:[#allocation1 + $0x38] sm:$0xff pattern:$0x73625140]  ;;  %v98_v19 = vld.sshfl [vmem:[#allocation1 + $0x28] sm:$0xff pattern:$0x73625140] }
  0x21   :  { %185 = vmatmul.f32.vlgmr.msra.gmra.mxu3 %v77_v5  ;;  %244 = vmatpush.xpose.msrb.mxu2 %v99_v16  ;;  %279 = vst [vmem:[#allocation1 + $0x20] ss:$4 sm:$0xff] %v274_v15  ;;  %v476_v4 = vld [vmem:[#allocation7 + $0x2] sm:$0x3] }
  0x22   :  { %145 = vmatmul.f32.vlgmr.msra.gmra.mxu1 %v75_v3  ;;  %204 = vmatpush.xpose.msrb.mxu0 %v97_v17 }
  0x23   :  { %264 = vmatpush.xpose.msrb.mxu3 %v100_v18  ;;  %224 = vmatpush.xpose.msrb.mxu1 %v98_v19 }
  0x25   :  { %v280_v20 = vld.sshfl [vmem:[#allocation1] sm:$0xff pattern:$0x73625140]  ;;  %v281_v21 = vld.sshfl [vmem:[#allocation1 + $0x8] sm:$0xff pattern:$0x73625140] }
  0x26   :  { %v282_v22 = vld.sshfl [vmem:[#allocation1 + $0x10] sm:$0xff pattern:$0x73625140]  ;;  %v283_v23 = vld.sshfl [vmem:[#allocation1 + $0x18] sm:$0xff pattern:$0x73625140] }
  0x27   :  { %296 = vst [vmem:[#allocation1] ss:$4 sm:$0xff] %v273_v10 }
  0x28   :  { %v284_v24 = vld.sshfl [vmem:[#allocation1 + $0x20] sm:$0xff pattern:$0x73625140]  ;;  %v285_v25 = vld.sshfl [vmem:[#allocation1 + $0x28] sm:$0xff pattern:$0x73625140]  ;;  %245 = vmatmul.f32.vlgmr.msrb.gmra.mxu2 %v80_v8  ;;  %205 = vmatmul.f32.vlgmr.msrb.gmra.mxu0 %v78_v6 }
  0x29   :  { %v286_v26 = vld.sshfl [vmem:[#allocation1 + $0x30] sm:$0xff pattern:$0x73625140]  ;;  %v287_v27 = vld.sshfl [vmem:[#allocation1 + $0x38] sm:$0xff pattern:$0x73625140]  ;;  %265 = vmatmul.f32.vlgmr.msrb.gmra.mxu3 %v81_v9 }
  0x2a   :  { %298 = vst [vmem:[#allocation1 + $0x20] ss:$4 sm:$0xff] %v274_v15  ;;  %225 = vmatmul.f32.vlgmr.msrb.gmra.mxu1 %v79_v7 }
  0x2e   :  { %v301_v28 = vld.sshfl [vmem:[#allocation1 + $0x10] sm:$0xff pattern:$0x73625140]  ;;  %v299_v29 = vld.sshfl [vmem:[#allocation1] sm:$0xff pattern:$0x73625140] }
  0x2f   :  { %370 = vmatpush.xpose.msra.mxu2 %v301_v28  ;;  %330 = vmatpush.xpose.msra.mxu0 %v299_v29  ;;  %v302_v30 = vld.sshfl [vmem:[#allocation1 + $0x18] sm:$0xff pattern:$0x73625140]  ;;  %v300_v31 = vld.sshfl [vmem:[#allocation1 + $0x8] sm:$0xff pattern:$0x73625140] }
  0x30   :  { %390 = vmatpush.xpose.msra.mxu3 %v302_v30  ;;  %350 = vmatpush.xpose.msra.mxu1 %v300_v31 }
  0x31   :  { %v305_v32 = vld.sshfl [vmem:[#allocation1 + $0x30] sm:$0xff pattern:$0x73625140]  ;;  %v303_v33 = vld.sshfl [vmem:[#allocation1 + $0x20] sm:$0xff pattern:$0x73625140] }
  0x32   :  { %371 = vmatmul.f32.vlgmr.msra.gmra.mxu2 %v282_v22  ;;  %331 = vmatmul.f32.vlgmr.msra.gmra.mxu0 %v280_v20  ;;  %v306_v34 = vld.sshfl [vmem:[#allocation1 + $0x38] sm:$0xff pattern:$0x73625140]  ;;  %v304_v35 = vld.sshfl [vmem:[#allocation1 + $0x28] sm:$0xff pattern:$0x73625140] }
  0x33   :  { %391 = vmatmul.f32.vlgmr.msra.gmra.mxu3 %v283_v23  ;;  %450 = vmatpush.xpose.msrb.mxu2 %v305_v32 }
  0x34   :  { %351 = vmatmul.f32.vlgmr.msra.gmra.mxu1 %v281_v21  ;;  %410 = vmatpush.xpose.msrb.mxu0 %v303_v33 }
  0x35   :  { %470 = vmatpush.xpose.msrb.mxu3 %v306_v34  ;;  %430 = vmatpush.xpose.msrb.mxu1 %v304_v35 }
  0x3a   :  { %451 = vmatmul.f32.vlgmr.msrb.gmra.mxu2 %v286_v26  ;;  %411 = vmatmul.f32.vlgmr.msrb.gmra.mxu0 %v284_v24 }
  0x3b   :  { %471 = vmatmul.f32.vlgmr.msrb.gmra.mxu3 %v287_v27 }
  0x3c   :  { %431 = vmatmul.f32.vlgmr.msrb.gmra.mxu1 %v285_v25 }
  0x9d   :  { %v126_v37 = vpop.f32.mrf.mxu0 }
  0x9f   :  { %v146_v38 = vpop.f32.mrf.mxu1 }
  0xa0   :  { %v147_v39 = vadd.f32 %v146_v38, %v126_v37 }
  0xa3   :  { %v166_v40 = vpop.f32.mrf.mxu2 }
  0xa4   :  { %v167_v41 = vadd.f32 %v166_v40, %v147_v39  ;;  %v186_v42 = vpop.f32.mrf.mxu3 }
  0xa5   :  { %v206_v43 = vpop.f32.mrf.mxu0 }
  0xa6   :  { %v187_v44 = vadd.f32 %v186_v42, %v167_v41 }
  0xa7   :  { %v226_v45 = vpop.f32.mrf.mxu1 }
  0xa8   :  { %v207_v46 = vadd.f32 %v206_v43, %v187_v44 }
  0xaa   :  { %v227_v47 = vadd.f32 %v226_v45, %v207_v46 }
  0xab   :  { %v246_v48 = vpop.f32.mrf.mxu2 }
  0xac   :  { %v247_v49 = vadd.f32 %v246_v48, %v227_v47  ;;  %v266_v50 = vpop.f32.mrf.mxu3 }
  0xae   :  { %v267_v52 = vadd.f32 %v266_v50, %v247_v49 }
  0xaf   :  { %v332_v53 = vpop.f32.mrf.mxu0 }
  0xb0   :  { %v270_v54 = vadd.f32 %v269_v51, %v267_v52 }
  0xb1   :  { %v352_v55 = vpop.f32.mrf.mxu1 }
  0xb2   :  { %272 = vst.msk [vmem:[#allocation7] sm:$0x3] %vm64_vm0, %v270_v54  ;;  %v353_v56 = vadd.f32 %v352_v55, %v332_v53 }
  0xb5   :  { %v372_v57 = vpop.f32.mrf.mxu2 }
  0xb6   :  { %v373_v58 = vadd.f32 %v372_v57, %v353_v56  ;;  %v392_v59 = vpop.f32.mrf.mxu3 }
  0xb7   :  { %v412_v60 = vpop.f32.mrf.mxu0 }
  0xb8   :  { %v393_v61 = vadd.f32 %v392_v59, %v373_v58 }
  0xb9   :  { %v432_v62 = vpop.f32.mrf.mxu1 }
  0xba   :  { %v413_v63 = vadd.f32 %v412_v60, %v393_v61 }
  0xbc   :  { %v433_v0 = vadd.f32 %v432_v62, %v413_v63 }
  0xbd   :  { %v452_v1 = vpop.f32.mrf.mxu2 }
  0xbe   :  { %v453_v2 = vadd.f32 %v452_v1, %v433_v0  ;;  %v472_v3 = vpop.f32.mrf.mxu3 }
  0xc0   :  { %v473_v5 = vadd.f32 %v472_v3, %v453_v2 }
  0xc2   :  { %v477_v6 = vadd.f32 %v476_v4, %v473_v5 }
  0xc4   :  { %478 = vst.msk [vmem:[#allocation7 + $0x2] sm:$0x3] %vm64_vm0, %v477_v6 }
  0xc5   :  { %491 = dma.vmem_to_hbm [thread:$0]  %s484_s1, 64, %s486_s21, [#allocation4], %s591_s22, %s591_s22, %s592_s23  }
  0xc6   :  { %585 = dma.done.wait [#allocation4], 64  }
  0xc7   :  { %586 = vsyncadd [#allocation4], 4294967232 }
  0xc8   :  { %496 = vsyncpa [#allocation3], 1 }
  0xc9   :  { %497 = vsyncpa [#allocation6], 1 }
  0xca   :  { %498 = vsyncpa [#allocation4], 1 }

</bundles_post_ra>
